<compile_context>
chip_gen: v5e
topology: v5e:2x2
jax: 0.10.0
libtpu: 0.0.40
codegen_flags: <defaults>
</compile_context>

<pallas_src>
import jax
import jax.numpy as jnp
from jax.experimental import pallas as pl
from jax.experimental.pallas import tpu as pltpu

WIDTH = 128     # lane-padded feature width used everywhere inside the kernel
HIDDEN = 64


def _round_up(a, m):
    return (a + m - 1) // m * m


def qnet_kernel(x_ref, w_ref, b_ref, o_ref):
    """One batch tile through the full 4-layer MLP. All operands lane-padded to 128."""
    x = x_ref[...]                      # (TB, 128)
    b = b_ref[...]                      # (8, 128) — rows 0..3 hold the per-layer biases

    h = jnp.dot(x, w_ref[0], preferred_element_type=jnp.float32) + b[0:1, :]
    h = jnp.maximum(h, 0.0)             # ReLU

    h = jnp.dot(h, w_ref[1], preferred_element_type=jnp.float32) + b[1:2, :]
    h = jnp.maximum(h, 0.0)             # ReLU

    h = jnp.dot(h, w_ref[2], preferred_element_type=jnp.float32) + b[2:3, :]
    h = jnp.maximum(h, 0.0)             # ReLU

    out = jnp.dot(h, w_ref[3], preferred_element_type=jnp.float32) + b[3:4, :]
    o_ref[...] = out.astype(o_ref.dtype)   # lane-dense (TB, 128) store


def pack_params(params, in_dim, out_dim):
    """Pack 4 (W, b) pairs into one (4,128,128) weight slab and one (8,128) bias tile.

    Weights are stored as (in_features, out_features) so the kernel computes x @ W + b
    (== PyTorch x @ W_pt.T + b). Padding is zero-filled so padded lanes stay exactly 0
    through every layer.
    """
    assert in_dim <= WIDTH and out_dim <= WIDTH
    (w1, b1), (w2, b2), (w3, b3), (w4, b4) = params

    w_packed = jnp.zeros((4, WIDTH, WIDTH), jnp.float32)
    w_packed = w_packed.at[0, :in_dim, :HIDDEN].set(w1.astype(jnp.float32))
    w_packed = w_packed.at[1, :HIDDEN, :HIDDEN].set(w2.astype(jnp.float32))
    w_packed = w_packed.at[2, :HIDDEN, :HIDDEN].set(w3.astype(jnp.float32))
    w_packed = w_packed.at[3, :HIDDEN, :out_dim].set(w4.astype(jnp.float32))

    b_packed = jnp.zeros((8, WIDTH), jnp.float32)
    b_packed = b_packed.at[0, :HIDDEN].set(b1.reshape(-1).astype(jnp.float32))
    b_packed = b_packed.at[1, :HIDDEN].set(b2.reshape(-1).astype(jnp.float32))
    b_packed = b_packed.at[2, :HIDDEN].set(b3.reshape(-1).astype(jnp.float32))
    b_packed = b_packed.at[3, :out_dim].set(b4.reshape(-1).astype(jnp.float32))
    return w_packed, b_packed


def qnet_forward(x, packed_params, out_dim, *, tb=512):
    """Full Qnet forward. x: (B, in_dim) f32. Returns (B, out_dim) f32."""
    w_packed, b_packed = packed_params
    B, in_dim = x.shape
    assert in_dim <= WIDTH and out_dim <= WIDTH

    # Batch tiling: one tile when small; TB-row tiles (grid over batch) when large.
    TB = min(tb, _round_up(B, 8))
    B_pad = _round_up(B, TB)
    grid = (B_pad // TB,)

    # Lane-pad features to 128 (zeros — inert against the zero-padded weight slab).
    x_pad = jnp.zeros((B_pad, WIDTH), jnp.float32).at[:B, :in_dim].set(
        x.astype(jnp.float32))

    out_padded = pl.pallas_call(
        qnet_kernel,
        out_shape=jax.ShapeDtypeStruct((B_pad, WIDTH), jnp.float32),
        grid_spec=pltpu.PrefetchScalarGridSpec(
            num_scalar_prefetch=0,
            grid=grid,
            in_specs=[
                pl.BlockSpec((TB, WIDTH), lambda i: (i, 0)),           # x: tiled over batch
                pl.BlockSpec((4, WIDTH, WIDTH), lambda i: (0, 0, 0)),  # weights: resident
                pl.BlockSpec((8, WIDTH), lambda i: (0, 0)),            # biases: resident
            ],
            out_specs=pl.BlockSpec((TB, WIDTH), lambda i: (i, 0)),
        ),
        compiler_params=pltpu.CompilerParams(
            dimension_semantics=("parallel",)),   # shards batch grid across v7x's 2 TCs
    )(x_pad, w_packed, b_packed)

    return out_padded[:B, :out_dim]


def init_params(key, input_layer, output_layer, hidden=HIDDEN):
    """Deterministic synthetic parameters (PyTorch nn.Linear-style uniform init)."""
    def linear(k, fan_in, fan_out):
        kw, kb = jax.random.split(k)
        bound = 1.0 / jnp.sqrt(jnp.float32(fan_in))
        # stored as (in, out) so the kernel computes x @ W + b
        w = jax.random.uniform(kw, (fan_in, fan_out), jnp.float32, -bound, bound)
        b = jax.random.uniform(kb, (1, fan_out), jnp.float32, -bound, bound)
        return w, b

    k1, k2, k3, k4 = jax.random.split(key, 4)
    return (
        linear(k1, input_layer, hidden),
        linear(k2, hidden, hidden),
        linear(k3, hidden, hidden),
        linear(k4, hidden, output_layer),
    )


def reference_forward(x, params):
    """Plain-JAX reference for correctness checking."""
    (w1, b1), (w2, b2), (w3, b3), (w4, b4) = params
    h = jnp.maximum(x @ w1 + b1, 0.0)
    h = jnp.maximum(h @ w2 + b2, 0.0)
    h = jnp.maximum(h @ w3 + b3, 0.0)
    return h @ w4 + b4


if __name__ == "__main__":
    key = jax.random.PRNGKey(0)
    k_params, k_x = jax.random.split(key)

    batch = 8
    input_layer = 32
    output_layer = 4

    params = init_params(k_params, input_layer, output_layer)
    packed = pack_params(params, input_layer, output_layer)
    x = jax.random.normal(k_x, (batch, input_layer), jnp.float32)

    out = qnet_forward(x, packed, output_layer)
    out = jax.block_until_ready(out)

    ref = reference_forward(x, params)
    assert out.shape == (batch, output_layer)
    assert jnp.allclose(out, ref, atol=1e-5, rtol=1e-5), "Pallas output mismatch vs reference"

    print("KERNEL_OK")
</pallas_src>

<mosaic_0001>
module attributes {stable_mosaic.version = 11 : i64} {
  func.func @qnet_kernel(%arg0: i32, %arg1: memref<8x128xf32, #tpu.memory_space<vmem>>, %arg2: memref<4x128x128xf32, #tpu.memory_space<vmem>>, %arg3: memref<8x128xf32, #tpu.memory_space<vmem>>, %arg4: memref<8x128xf32, #tpu.memory_space<vmem>>) attributes {dimension_semantics = [#tpu.dimension_semantics<parallel>], iteration_bounds = array<i64: 1>, scalar_prefetch = 0 : i64, scratch_operands = 0 : i64, tpu.core_type = #tpu.core_type<tc>, window_params = [{transform_indices = @transform_0, window_bounds = array<i64: 8, 128>}, {pipeline_mode = #tpu.pipeline_mode<synchronous>, transform_indices = @transform_1, window_bounds = array<i64: 4, 128, 128>}, {pipeline_mode = #tpu.pipeline_mode<synchronous>, transform_indices = @transform_2, window_bounds = array<i64: 8, 128>}, {transform_indices = @transform_3, window_bounds = array<i64: 8, 128>}]} {
    %c0 = arith.constant 0 : index
    %c0_0 = arith.constant 0 : index
    %0 = vector.load %arg1[%c0, %c0_0] : memref<8x128xf32, #tpu.memory_space<vmem>>, vector<8x128xf32>
    %c0_1 = arith.constant 0 : index
    %c0_2 = arith.constant 0 : index
    %1 = vector.load %arg3[%c0_1, %c0_2] : memref<8x128xf32, #tpu.memory_space<vmem>>, vector<8x128xf32>
    %c0_3 = arith.constant 0 : index
    %c0_4 = arith.constant 0 : index
    %c0_5 = arith.constant 0 : index
    %2 = vector.load %arg2[%c0_3, %c0_4, %c0_5] : memref<4x128x128xf32, #tpu.memory_space<vmem>>, vector<1x128x128xf32>
    %3 = vector.shape_cast %2 : vector<1x128x128xf32> to vector<128x128xf32>
    %cst = arith.constant dense<0.000000e+00> : vector<8x128xf32>
    %4 = tpu.matmul %0, %3, %cst {dimension_numbers = #tpu.dot_dimension_numbers<[1], [0], [0], [1], [0, 0, 1, 1], [], []>} : vector<8x128xf32>, vector<128x128xf32>, vector<8x128xf32> -> vector<8x128xf32>
    %5 = vector.extract_strided_slice %1 {offsets = [0, 0], sizes = [1, 128], strides = [1, 1]} : vector<8x128xf32> to vector<1x128xf32>
    %6 = vector.broadcast %5 : vector<1x128xf32> to vector<8x128xf32>
    %7 = arith.addf %4, %6 : vector<8x128xf32>
    %cst_6 = arith.constant 0.000000e+00 : f32
    %8 = vector.broadcast %cst_6 : f32 to vector<8x128xf32>
    %9 = arith.maximumf %7, %8 : vector<8x128xf32>
    %c1 = arith.constant 1 : index
    %c0_7 = arith.constant 0 : index
    %c0_8 = arith.constant 0 : index
    %10 = vector.load %arg2[%c1, %c0_7, %c0_8] : memref<4x128x128xf32, #tpu.memory_space<vmem>>, vector<1x128x128xf32>
    %11 = vector.shape_cast %10 : vector<1x128x128xf32> to vector<128x128xf32>
    %cst_9 = arith.constant dense<0.000000e+00> : vector<8x128xf32>
    %12 = tpu.matmul %9, %11, %cst_9 {dimension_numbers = #tpu.dot_dimension_numbers<[1], [0], [0], [1], [0, 0, 1, 1], [], []>} : vector<8x128xf32>, vector<128x128xf32>, vector<8x128xf32> -> vector<8x128xf32>
    %13 = vector.extract_strided_slice %1 {offsets = [1, 0], sizes = [1, 128], strides = [1, 1]} : vector<8x128xf32> to vector<1x128xf32>
    %14 = vector.broadcast %13 : vector<1x128xf32> to vector<8x128xf32>
    %15 = arith.addf %12, %14 : vector<8x128xf32>
    %cst_10 = arith.constant 0.000000e+00 : f32
    %16 = vector.broadcast %cst_10 : f32 to vector<8x128xf32>
    %17 = arith.maximumf %15, %16 : vector<8x128xf32>
    %c2 = arith.constant 2 : index
    %c0_11 = arith.constant 0 : index
    %c0_12 = arith.constant 0 : index
    %18 = vector.load %arg2[%c2, %c0_11, %c0_12] : memref<4x128x128xf32, #tpu.memory_space<vmem>>, vector<1x128x128xf32>
    %19 = vector.shape_cast %18 : vector<1x128x128xf32> to vector<128x128xf32>
    %cst_13 = arith.constant dense<0.000000e+00> : vector<8x128xf32>
    %20 = tpu.matmul %17, %19, %cst_13 {dimension_numbers = #tpu.dot_dimension_numbers<[1], [0], [0], [1], [0, 0, 1, 1], [], []>} : vector<8x128xf32>, vector<128x128xf32>, vector<8x128xf32> -> vector<8x128xf32>
    %21 = vector.extract_strided_slice %1 {offsets = [2, 0], sizes = [1, 128], strides = [1, 1]} : vector<8x128xf32> to vector<1x128xf32>
    %22 = vector.broadcast %21 : vector<1x128xf32> to vector<8x128xf32>
    %23 = arith.addf %20, %22 : vector<8x128xf32>
    %cst_14 = arith.constant 0.000000e+00 : f32
    %24 = vector.broadcast %cst_14 : f32 to vector<8x128xf32>
    %25 = arith.maximumf %23, %24 : vector<8x128xf32>
    %c3 = arith.constant 3 : index
    %c0_15 = arith.constant 0 : index
    %c0_16 = arith.constant 0 : index
    %26 = vector.load %arg2[%c3, %c0_15, %c0_16] : memref<4x128x128xf32, #tpu.memory_space<vmem>>, vector<1x128x128xf32>
    %27 = vector.shape_cast %26 : vector<1x128x128xf32> to vector<128x128xf32>
    %cst_17 = arith.constant dense<0.000000e+00> : vector<8x128xf32>
    %28 = tpu.matmul %25, %27, %cst_17 {dimension_numbers = #tpu.dot_dimension_numbers<[1], [0], [0], [1], [0, 0, 1, 1], [], []>} : vector<8x128xf32>, vector<128x128xf32>, vector<8x128xf32> -> vector<8x128xf32>
    %29 = vector.extract_strided_slice %1 {offsets = [3, 0], sizes = [1, 128], strides = [1, 1]} : vector<8x128xf32> to vector<1x128xf32>
    %30 = vector.broadcast %29 : vector<1x128xf32> to vector<8x128xf32>
    %31 = arith.addf %28, %30 : vector<8x128xf32>
    %c0_18 = arith.constant 0 : index
    %c0_19 = arith.constant 0 : index
    %32 = vector.load %arg4[%c0_18, %c0_19] : memref<8x128xf32, #tpu.memory_space<vmem>>, vector<8x128xf32>
    tpu.vector_store %arg4[%c0_18, %c0_19], %31 {strides = array<i32>} : memref<8x128xf32, #tpu.memory_space<vmem>>, vector<8x128xf32>,
    return
  }
  func.func @transform_0(%arg0: i32) -> (i32, i32) {
    %c0_i32 = arith.constant 0 : i32
    %c0_i32_0 = arith.constant 0 : i32
    return %arg0, %c0_i32 : i32, i32
  }
  func.func @transform_1(%arg0: i32) -> (i32, i32, i32) {
    %c0_i32 = arith.constant 0 : i32
    %c0_i32_0 = arith.constant 0 : i32
    %c0_i32_1 = arith.constant 0 : i32
    %c0_i32_2 = arith.constant 0 : i32
    return %c0_i32, %c0_i32_0, %c0_i32_1 : i32, i32, i32
  }
  func.func @transform_2(%arg0: i32) -> (i32, i32) {
    %c0_i32 = arith.constant 0 : i32
    %c0_i32_0 = arith.constant 0 : i32
    %c0_i32_1 = arith.constant 0 : i32
    return %c0_i32, %c0_i32_0 : i32, i32
  }
  func.func @transform_3(%arg0: i32) -> (i32, i32) {
    %c0_i32 = arith.constant 0 : i32
    %c0_i32_0 = arith.constant 0 : i32
    return %arg0, %c0_i32 : i32, i32
  }
}

</mosaic_0001>

<bundles_post_ra>
// kernel: tpu_custom_call.1
= control target key start
LH: loop header
LB: loop body
LE: loop exit
PB: predicated region body
PF: predicated region fallthrough
CT: control target
= control target key end

     0   :  { %8 = vsyncpa [#allocation3], 0  ;;  %s385_s0 = inlined_call_operand.hbm [shape: f32[8,128], index: 0, kind: input, shape index: {}]   ;;  %s386_s1 = inlined_call_operand.hbm [shape: f32[4,128,128], index: 1, kind: input, shape index: {}]   ;;  %s387_s2 = inlined_call_operand.hbm [shape: f32[8,128], index: 2, kind: input, shape index: {}]   ;;  %s388_s3 = inlined_call_operand.hbm [shape: f32[8,128], index: 3, kind: output, shape index: {}]  }
   0x1   :  { %9 = vsyncpa [#allocation6], 0  ;;  %s26_s14 = sshll.u32 %s386_s1, 4  ;;  %s27_s14 = int_to_ptr.hbm [resolvable:$true] %s26_s14 }
   0x2   :  { %10 = vsyncpa [#allocation4], 0  ;;  %s341_s15 = smov [#allocation5]   ;;  %s16_s19 = sshll.u32 %s385_s0, 4  ;;  %s17_s19 = int_to_ptr.hbm [resolvable:$true] %s16_s19 }
   0x3   :  { %s28_s16 = sshll.u32 %s341_s15, 4  ;;  %s342_s20 = smov 128   ;;  %s29_s16 = int_to_ptr.vmem [resolvable:$true] %s28_s16 }
   0x4   :  { %s343_s21 = smov 8   ;;  %s344_s22 = smov [#allocation2]  }
   0x5   :  { %34 = dma.hbm_to_vmem [thread:$0]  %s27_s14, 8192, %s29_s16, [#allocation6], %s342_s20, %s342_s20, %s343_s21  }
   0x6   :  { %s18_s23 = sshll.u32 %s344_s22, 4  ;;  %s40_s26 = sshll.u32 %s387_s2, 4  ;;  %s19_s23 = int_to_ptr.vmem [resolvable:$true] %s18_s23  ;;  %s41_s26 = int_to_ptr.hbm [resolvable:$true] %s40_s26 }
   0x7   :  { %21 = dma.hbm_to_vmem [thread:$0]  %s17_s19, 128, %s19_s23, [#allocation3]  }
   0x8   :  { %s345_s1 = smov [#allocation7]  }
   0x9   :  { %s42_s27 = sshll.u32 %s345_s1, 4  ;;  %s43_s27 = int_to_ptr.vmem [resolvable:$true] %s42_s27 }
   0xa   :  { %45 = dma.hbm_to_vmem [thread:$0]  %s41_s26, 128, %s43_s27, [#allocation6]  }
   0xb   :  { %335 = dma.done.wait [#allocation3], 128  }
   0xc   :  { %336 = vsyncadd [#allocation3], 4294967168 }
   0xd   :  { %337 = dma.done.wait [#allocation6], 8320  }
   0xe   :  { %338 = vsyncadd [#allocation6], 4294958976  ;;  %v75_v0 = vld [vmem:[#allocation5 + $0x78] sm:$0xff]  ;;  %v74_v1 = vld [vmem:[#allocation5 + $0x70] sm:$0xff]  ;;  %s346_s0 = smov [#allocation8]   ;;  %s222_s30 = sshll.u32 %s388_s3, 4  ;;  %s223_s30 = int_to_ptr.hbm [resolvable:$true] %s222_s30 }
   0xf   :  { %77 = vmatpush.msra.mxu0 %v75_v0  ;;  %v73_v2 = vld [vmem:[#allocation5 + $0x68] sm:$0xff]  ;;  %v72_v3 = vld [vmem:[#allocation5 + $0x60] sm:$0xff]  ;;  %v114_v4 = vld [vmem:[#allocation5 + $0xf8] sm:$0xff]  ;;  %s220_s2 = sshll.u32 %s346_s0, 4  ;;  %s221_s2 = int_to_ptr.vmem [resolvable:$true] %s220_s2 }
  0x10   :  { %v71_v5 = vld [vmem:[#allocation5 + $0x58] sm:$0xff]  ;;  %116 = vmatpush.msra.mxu1 %v114_v4  ;;  %v113_v6 = vld [vmem:[#allocation5 + $0xf0] sm:$0xff]  ;;  %v112_v7 = vld [vmem:[#allocation5 + $0xe8] sm:$0xff] }
  0x11   :  { %78 = vmatpush.msra.mxu0 %v74_v1  ;;  %v70_v8 = vld [vmem:[#allocation5 + $0x50] sm:$0xff]  ;;  %v111_v9 = vld [vmem:[#allocation5 + $0xe0] sm:$0xff]  ;;  %v69_v10 = vld [vmem:[#allocation5 + $0x48] sm:$0xff] }
  0x12   :  { %117 = vmatpush.msra.mxu1 %v113_v6  ;;  %v110_v11 = vld [vmem:[#allocation5 + $0xd8] sm:$0xff]  ;;  %v68_v12 = vld [vmem:[#allocation5 + $0x40] sm:$0xff]  ;;  %v109_v13 = vld [vmem:[#allocation5 + $0xd0] sm:$0xff] }
  0x13   :  { %79 = vmatpush.msra.mxu0 %v73_v2  ;;  %v67_v14 = vld [vmem:[#allocation5 + $0x38] sm:$0xff]  ;;  %v108_v15 = vld [vmem:[#allocation5 + $0xc8] sm:$0xff]  ;;  %v66_v16 = vld [vmem:[#allocation5 + $0x30] sm:$0xff] }
  0x14   :  { %118 = vmatpush.msra.mxu1 %v112_v7  ;;  %v107_v17 = vld [vmem:[#allocation5 + $0xc0] sm:$0xff]  ;;  %v65_v18 = vld [vmem:[#allocation5 + $0x28] sm:$0xff]  ;;  %v106_v19 = vld [vmem:[#allocation5 + $0xb8] sm:$0xff] }
  0x15   :  { %80 = vmatpush.msra.mxu0 %v72_v3  ;;  %v64_v20 = vld [vmem:[#allocation5 + $0x20] sm:$0xff]  ;;  %v105_v21 = vld [vmem:[#allocation5 + $0xb0] sm:$0xff]  ;;  %v63_v22 = vld [vmem:[#allocation5 + $0x18] sm:$0xff] }
  0x16   :  { %119 = vmatpush.msra.mxu1 %v111_v9  ;;  %v104_v23 = vld [vmem:[#allocation5 + $0xa8] sm:$0xff]  ;;  %v62_v24 = vld [vmem:[#allocation5 + $0x10] sm:$0xff]  ;;  %v103_v25 = vld [vmem:[#allocation5 + $0xa0] sm:$0xff] }
  0x17   :  { %81 = vmatpush.msra.mxu0 %v71_v5  ;;  %v61_v26 = vld [vmem:[#allocation5 + $0x8] sm:$0xff]  ;;  %v102_v27 = vld [vmem:[#allocation5 + $0x98] sm:$0xff]  ;;  %v60_v28 = vld [vmem:[#allocation5] sm:$0xff] }
  0x18   :  { %120 = vmatpush.msra.mxu1 %v110_v11  ;;  %v58_v29 = vld [vmem:[#allocation2] sm:$0xff]  ;;  %v101_v30 = vld [vmem:[#allocation5 + $0x90] sm:$0xff]  ;;  %v100_v31 = vld [vmem:[#allocation5 + $0x88] sm:$0xff] }
  0x19   :  { %82 = vmatpush.msra.mxu0 %v70_v8  ;;  %v99_v32 = vld [vmem:[#allocation5 + $0x80] sm:$0xff]  ;;  %v153_v33 = vld [vmem:[#allocation5 + $0x178] sm:$0xff]  ;;  %v152_v34 = vld [vmem:[#allocation5 + $0x170] sm:$0xff] }
  0x1a   :  { %121 = vmatpush.msra.mxu1 %v109_v13  ;;  %155 = vmatpush.msra.mxu2 %v153_v33  ;;  %v151_v35 = vld [vmem:[#allocation5 + $0x168] sm:$0xff]  ;;  %v150_v36 = vld [vmem:[#allocation5 + $0x160] sm:$0xff]  ;;  %v149_v37 = vld [vmem:[#allocation5 + $0x158] sm:$0xff] }
  0x1b   :  { %83 = vmatpush.msra.mxu0 %v69_v10  ;;  %v148_v38 = vld [vmem:[#allocation5 + $0x150] sm:$0xff]  ;;  %v147_v39 = vld [vmem:[#allocation5 + $0x148] sm:$0xff]  ;;  %v146_v40 = vld [vmem:[#allocation5 + $0x140] sm:$0xff] }
  0x1c   :  { %122 = vmatpush.msra.mxu1 %v108_v15  ;;  %156 = vmatpush.msra.mxu2 %v152_v34  ;;  %v145_v41 = vld [vmem:[#allocation5 + $0x138] sm:$0xff]  ;;  %v144_v42 = vld [vmem:[#allocation5 + $0x130] sm:$0xff]  ;;  %v143_v43 = vld [vmem:[#allocation5 + $0x128] sm:$0xff] }
  0x1d   :  { %84 = vmatpush.msra.mxu0 %v68_v12  ;;  %v142_v44 = vld [vmem:[#allocation5 + $0x120] sm:$0xff]  ;;  %v141_v46 = vld [vmem:[#allocation5 + $0x118] sm:$0xff]  ;;  %v140_v51 = vld [vmem:[#allocation5 + $0x110] sm:$0xff] }
  0x1e   :  { %123 = vmatpush.msra.mxu1 %v107_v17  ;;  %157 = vmatpush.msra.mxu2 %v151_v35  ;;  %v376_v45 = vld [vmem:[#allocation7] sm:$0xff]  ;;  %v139_v52 = vld [vmem:[#allocation5 + $0x108] sm:$0xff]  ;;  %v192_v54 = vld [vmem:[#allocation5 + $0x1f8] sm:$0xff] }
  0x1f   :  { %85 = vmatpush.msra.mxu0 %v67_v14  ;;  %v76_v47 = vperm.slane %v376_v45, 0  ;;  %v138_v53 = vld [vmem:[#allocation5 + $0x100] sm:$0xff]  ;;  %v191_v55 = vld [vmem:[#allocation5 + $0x1f0] sm:$0xff]  ;;  %194 = vmatpush.msra.mxu3 %v192_v54  ;;  %v190_v56 = vld [vmem:[#allocation5 + $0x1e8] sm:$0xff]  ;;  %v115_v3 = vperm.slane %v376_v45, 1  ;;  %v154_v10 = vperm.slane %v376_v45, 2 }
  0x20   :  { %124 = vmatpush.msra.mxu1 %v106_v19  ;;  %158 = vmatpush.msra.mxu2 %v150_v36  ;;  %v189_v57 = vld [vmem:[#allocation5 + $0x1e0] sm:$0xff]  ;;  %v188_v58 = vld [vmem:[#allocation5 + $0x1d8] sm:$0xff]  ;;  %v187_v59 = vld [vmem:[#allocation5 + $0x1d0] sm:$0xff]  ;;  %v193_v14 = vperm.slane %v376_v45, 3 }
  0x21   :  { %86 = vmatpush.msra.mxu0 %v66_v16  ;;  %195 = vmatpush.msra.mxu3 %v191_v55  ;;  %v186_v60 = vld [vmem:[#allocation5 + $0x1c8] sm:$0xff]  ;;  %v185_v61 = vld [vmem:[#allocation5 + $0x1c0] sm:$0xff]  ;;  %v184_v62 = vld [vmem:[#allocation5 + $0x1b8] sm:$0xff] }
  0x22   :  { %125 = vmatpush.msra.mxu1 %v105_v21  ;;  %159 = vmatpush.msra.mxu2 %v149_v37  ;;  %v183_v63 = vld [vmem:[#allocation5 + $0x1b0] sm:$0xff]  ;;  %v182_v0 = vld [vmem:[#allocation5 + $0x1a8] sm:$0xff]  ;;  %v181_v1 = vld [vmem:[#allocation5 + $0x1a0] sm:$0xff] }
  0x23   :  { %87 = vmatpush.msra.mxu0 %v65_v18  ;;  %196 = vmatpush.msra.mxu3 %v190_v56  ;;  %v180_v2 = vld [vmem:[#allocation5 + $0x198] sm:$0xff]  ;;  %v179_v7 = vld [vmem:[#allocation5 + $0x190] sm:$0xff]  ;;  %v178_v8 = vld [vmem:[#allocation5 + $0x188] sm:$0xff] }
  0x24   :  { %126 = vmatpush.msra.mxu1 %v104_v23  ;;  %160 = vmatpush.msra.mxu2 %v148_v38  ;;  %v177_v9 = vld [vmem:[#allocation5 + $0x180] sm:$0xff] }
  0x25   :  { %88 = vmatpush.msra.mxu0 %v64_v20  ;;  %197 = vmatpush.msra.mxu3 %v189_v57 }
  0x26   :  { %127 = vmatpush.msra.mxu1 %v103_v25  ;;  %161 = vmatpush.msra.mxu2 %v147_v39 }
  0x27   :  { %89 = vmatpush.msra.mxu0 %v63_v22  ;;  %198 = vmatpush.msra.mxu3 %v188_v58 }
  0x28   :  { %128 = vmatpush.msra.mxu1 %v102_v27  ;;  %162 = vmatpush.msra.mxu2 %v146_v40 }
  0x29   :  { %90 = vmatpush.msra.mxu0 %v62_v24  ;;  %199 = vmatpush.msra.mxu3 %v187_v59 }
  0x2a   :  { %129 = vmatpush.msra.mxu1 %v101_v30  ;;  %163 = vmatpush.msra.mxu2 %v145_v41 }
  0x2b   :  { %91 = vmatpush.msra.mxu0 %v61_v26  ;;  %200 = vmatpush.msra.mxu3 %v186_v60 }
  0x2c   :  { %130 = vmatpush.msra.mxu1 %v100_v31  ;;  %164 = vmatpush.msra.mxu2 %v144_v42 }
  0x2d   :  { %92 = vmatpush.msra.mxu0 %v60_v28  ;;  %201 = vmatpush.msra.mxu3 %v185_v61 }
  0x2e   :  { %93 = vmatmul.f32.vlgmr.msra.gmra.mxu0 %v58_v29  ;;  %131 = vmatpush.msra.mxu1 %v99_v32 }
  0x2f   :  { %165 = vmatpush.msra.mxu2 %v143_v43  ;;  %202 = vmatpush.msra.mxu3 %v184_v62 }
  0x31   :  { %166 = vmatpush.msra.mxu2 %v142_v44  ;;  %203 = vmatpush.msra.mxu3 %v183_v63 }
  0x33   :  { %167 = vmatpush.msra.mxu2 %v141_v46  ;;  %204 = vmatpush.msra.mxu3 %v182_v0 }
  0x35   :  { %168 = vmatpush.msra.mxu2 %v140_v51  ;;  %205 = vmatpush.msra.mxu3 %v181_v1 }
  0x37   :  { %169 = vmatpush.msra.mxu2 %v139_v52  ;;  %206 = vmatpush.msra.mxu3 %v180_v2 }
  0x39   :  { %170 = vmatpush.msra.mxu2 %v138_v53  ;;  %207 = vmatpush.msra.mxu3 %v179_v7 }
  0x3b   :  { %208 = vmatpush.msra.mxu3 %v178_v8 }
  0x3d   :  { %209 = vmatpush.msra.mxu3 %v177_v9 }
  0xab   :  { %v94_v48 = vpop.f32.mrf.mxu0 }
  0xac   :  { %v95_v49 = vadd.f32 %v94_v48, %v76_v47 }
  0xae   :  { %v97_v50 = vmax.f32 %v95_v49, 0.0 }
  0xb0   :  { %132 = vmatmul.f32.vlgmr.msra.gmra.mxu1 %v97_v50 }
 0x12d   :  { %v133_v4 = vpop.f32.mrf.mxu1 }
 0x12e   :  { %v134_v5 = vadd.f32 %v133_v4, %v115_v3 }
 0x130   :  { %v136_v6 = vmax.f32 %v134_v5, 0.0 }
 0x132   :  { %171 = vmatmul.f32.vlgmr.msra.gmra.mxu2 %v136_v6 }
 0x1b5   :  { %v172_v11 = vpop.f32.mrf.mxu2 }
 0x1b6   :  { %v173_v12 = vadd.f32 %v172_v11, %v154_v10 }
 0x1b8   :  { %v175_v13 = vmax.f32 %v173_v12, 0.0 }
 0x1ba   :  { %210 = vmatmul.f32.vlgmr.msra.gmra.mxu3 %v175_v13 }
 0x23d   :  { %v211_v15 = vpop.f32.mrf.mxu3 }
 0x23e   :  { %v212_v16 = vadd.f32 %v211_v15, %v193_v14 }
 0x240   :  { %214 = vst [vmem:[#allocation8] sm:$0xff] %v212_v16 }
 0x241   :  { %225 = dma.vmem_to_hbm [thread:$0]  %s221_s2, 128, %s223_s30, [#allocation4]  }
 0x242   :  { %339 = dma.done.wait [#allocation4], 128  }
 0x243   :  { %340 = vsyncadd [#allocation4], 4294967168 }
 0x244   :  { %230 = vsyncpa [#allocation3], 1 }
 0x245   :  { %231 = vsyncpa [#allocation6], 1 }
 0x246   :  { %232 = vsyncpa [#allocation4], 1 }

</bundles_post_ra>
